<compile_context>
chip_gen: v7x
topology: tpu7x:2x2x1
jax: 0.10.0
libtpu: 0.0.40
codegen_flags: <defaults>
</compile_context>

<pallas_src>
import functools

import jax
import jax.numpy as jnp
from jax.experimental import pallas as pl
from jax.experimental.pallas import tpu as pltpu

KERNEL_SIZE = 7


def _residual_unit_kernel(ctx_ref, x_ref, w1_ref, b1_ref, w2_ref, b2_ref,
                          o_ref, win_ref, slab_ref, *, dilation, pad_r):
    # ctx_ref : (1, 1, C, pad_r)    causal left context for this tile (zeros at t<0)
    # x_ref   : (1, C, T_TILE)      current time tile (conv input AND residual)
    # w1_ref  : (C, K*C)            flattened dilated-conv weight (im2col layout)
    # b1_ref  : (C, 1)              f32
    # w2_ref  : (C, C)              1x1 conv weight
    # b2_ref  : (C, 1)              f32
    # o_ref   : (1, C, T_TILE)
    # win_ref : (C, pad_r + T_TILE) VMEM scratch: contiguous causal window
    # slab_ref: (K*C, T_TILE)       VMEM scratch: im2col slab
    C = x_ref.shape[1]
    T = x_ref.shape[2]
    pad = dilation * (KERNEL_SIZE - 1)

    # Assemble the contiguous causal window at lane-aligned offsets.
    win_ref[:, :pad_r] = ctx_ref[0, 0]
    win_ref[:, pad_r:] = x_ref[0]

    # im2col: slab[k*C + cin, t] = x_global[t0 + t + k*dilation - pad]
    for k in range(KERNEL_SIZE):
        s = (pad_r - pad) + k * dilation          # static offset
        slab_ref[k * C:(k + 1) * C, :] = win_ref[:, s:s + T]

    # Causal dilated conv as a single MXU matmul (contraction depth K*C).
    h = jnp.dot(w1_ref[...], slab_ref[...],
                preferred_element_type=jnp.float32)              # (C, T) f32
    h = h + b1_ref[...]

    # ELU (alpha = 1).  exp(min(h,0)) keeps the dead branch finite.
    h = jnp.where(h > 0, h, jnp.exp(jnp.minimum(h, 0.0)) - 1.0)

    # 1x1 conv == channel matmul, bias, residual add.
    # TODO(synk): for bf16 inputs the second matmul could also run in bf16.
    y = jnp.dot(w2_ref[...].astype(jnp.float32), h,
                preferred_element_type=jnp.float32)              # (C, T) f32
    y = y + b2_ref[...]
    o_ref[0] = (x_ref[0].astype(jnp.float32) + y).astype(o_ref.dtype)


def _choose_t_tile(T, C, itemsize):
    """Largest time tile that divides T, is lane-friendly, and keeps the
    (K*C, T_TILE) im2col slab around ~6 MiB (safe for v7x's 64 MiB VMEM)."""
    budget = 6 * 1024 * 1024
    cap = max(128, budget // (KERNEL_SIZE * C * itemsize))
    cap = min(4096, (cap // 128) * 128)
    if T <= cap:
        return T
    for cand in range(cap, 127, -128):
        if T % cand == 0:
            return cand
    return T   # irregular T: fall back to a single tile per batch element


def _build_context(x_nct, t_tile, pad_r):
    """ctx[n, ti, :, j] = x[n, :, ti*t_tile - pad_r + j], zero where t < 0.
    Only touches pad_r columns per tile -> negligible extra HBM traffic."""
    N, C, T = x_nct.shape
    nt = T // t_tile
    chunks = []
    for ti in range(nt):
        lo = ti * t_tile - pad_r
        if lo >= 0:
            chunks.append(x_nct[:, :, lo:ti * t_tile])
        else:
            z = jnp.zeros((N, C, -lo), x_nct.dtype)
            chunks.append(jnp.concatenate([z, x_nct[:, :, :ti * t_tile]], axis=-1))
    return jnp.stack(chunks, axis=1)   # (N, nt, C, pad_r)


def residual_unit(x_nct, w1, b1, w2, b2, dilation, t_tile=None):
    """ResidualUnit forward.

    x_nct: (N, C, T)              (PyTorch Conv1d layout)
    w1   : (C_out, C_in, K)       causal dilated conv weight
    b1   : (C_out,)
    w2   : (C_out, C_in, 1)       1x1 conv weight
    b2   : (C_out,)
    Returns (N, C, T) in x_nct.dtype.
    """
    N, C, T = x_nct.shape
    K = w1.shape[-1]
    assert K == KERNEL_SIZE
    pad = dilation * (K - 1)
    # Round the halo up to a lane multiple so scratch stores stay aligned.
    pad_r = ((pad + 127) // 128) * 128
    dtype = x_nct.dtype
    itemsize = jnp.dtype(dtype).itemsize

    if t_tile is None:
        t_tile = _choose_t_tile(T, C, itemsize)
    assert T % t_tile == 0
    nt = T // t_tile

    ctx = _build_context(x_nct, t_tile, pad_r)            # (N, nt, C, pad_r)

    # im2col weight layout: w1f[c_out, k*C_in + c_in] = w1[c_out, c_in, k]
    w1f = jnp.transpose(w1, (0, 2, 1)).reshape(w1.shape[0], K * C).astype(dtype)
    w2m = w2[:, :, 0].astype(dtype)                       # (C_out, C_in)
    b1c = b1.reshape(-1, 1).astype(jnp.float32)
    b2c = b2.reshape(-1, 1).astype(jnp.float32)

    kernel = functools.partial(_residual_unit_kernel,
                               dilation=dilation, pad_r=pad_r)

    out = pl.pallas_call(
        kernel,
        out_shape=jax.ShapeDtypeStruct((N, C, T), dtype),
        grid_spec=pltpu.PrefetchScalarGridSpec(
            num_scalar_prefetch=0,
            grid=(N, nt),
            in_specs=[
                pl.BlockSpec((1, 1, C, pad_r), lambda n, ti: (n, ti, 0, 0)),
                pl.BlockSpec((1, C, t_tile), lambda n, ti: (n, 0, ti)),
                pl.BlockSpec((C, K * C), lambda n, ti: (0, 0)),
                pl.BlockSpec((C, 1), lambda n, ti: (0, 0)),
                pl.BlockSpec((C, C), lambda n, ti: (0, 0)),
                pl.BlockSpec((C, 1), lambda n, ti: (0, 0)),
            ],
            out_specs=pl.BlockSpec((1, C, t_tile), lambda n, ti: (n, 0, ti)),
            scratch_shapes=[
                pltpu.VMEM((C, pad_r + t_tile), dtype),     # causal window
                pltpu.VMEM((K * C, t_tile), dtype),         # im2col slab
            ],
        ),
        compiler_params=pltpu.CompilerParams(
            dimension_semantics=("parallel", "parallel"),
            vmem_limit_bytes=48 * 1024 * 1024,
        ),
    )(ctx, x_nct, w1f, b1c, w2m, b2c)
    return out


def _reference(x_nct, w1, b1, w2, b2, dilation):
    """Pure-JAX reference matching the PyTorch forward (N, C, T layout)."""
    N, C, T = x_nct.shape
    K = w1.shape[-1]
    pad = dilation * (K - 1)
    xpad = jnp.pad(x_nct, ((0, 0), (0, 0), (pad, 0)))
    h = jnp.zeros((N, w1.shape[0], T), jnp.float32)
    for k in range(K):
        seg = xpad[:, :, k * dilation:k * dilation + T]
        h = h + jnp.einsum('oi,nit->not', w1[:, :, k], seg)
    h = h + b1[None, :, None]
    h = jnp.where(h > 0, h, jnp.exp(jnp.minimum(h, 0.0)) - 1.0)   # ELU
    y = jnp.einsum('oi,nit->not', w2[:, :, 0], h) + b2[None, :, None]
    return x_nct + y


if __name__ == "__main__":
    key = jax.random.PRNGKey(0)

    # --- test 1: small shape from the module spec (single time tile) ---
    N, C, T = 2, 4, 16
    dilation = 3
    k1, k2, k3, k4, k5, key = jax.random.split(key, 6)
    x = jax.random.normal(k1, (N, C, T), jnp.float32)
    w1 = jax.random.normal(k2, (C, C, KERNEL_SIZE), jnp.float32) * 0.1
    b1 = jax.random.normal(k3, (C,), jnp.float32) * 0.1
    w2 = jax.random.normal(k4, (C, C, 1), jnp.float32) * 0.1
    b2 = jax.random.normal(k5, (C,), jnp.float32) * 0.1

    out = jax.block_until_ready(residual_unit(x, w1, b1, w2, b2, dilation))
    ref = _reference(x, w1, b1, w2, b2, dilation)
    assert out.shape == (N, C, T) and out.dtype == x.dtype
    assert jnp.allclose(out, ref, atol=1e-5, rtol=1e-5)

    # --- test 2: exercise the time-tiled (halo) path: nt = 2 ---
    N2, C2, T2, d2 = 1, 8, 256, 2
    k1, k2, k3, k4, k5, key = jax.random.split(key, 6)
    x2 = jax.random.normal(k1, (N2, C2, T2), jnp.float32)
    w1b = jax.random.normal(k2, (C2, C2, KERNEL_SIZE), jnp.float32) * 0.1
    b1b = jax.random.normal(k3, (C2,), jnp.float32) * 0.1
    w2b = jax.random.normal(k4, (C2, C2, 1), jnp.float32) * 0.1
    b2b = jax.random.normal(k5, (C2,), jnp.float32) * 0.1

    out2 = jax.block_until_ready(
        residual_unit(x2, w1b, b1b, w2b, b2b, d2, t_tile=128))
    ref2 = _reference(x2, w1b, b1b, w2b, b2b, d2)
    assert jnp.allclose(out2, ref2, atol=1e-5, rtol=1e-5)

    print("KERNEL_OK")
</pallas_src>

<mosaic_0001>
module attributes {stable_mosaic.version = 11 : i64} {
  func.func @_residual_unit_kernel(%arg0: i32, %arg1: i32, %arg2: memref<1x1x4x128xf32, #tpu.memory_space<vmem>>, %arg3: memref<1x4x16xf32, #tpu.memory_space<vmem>>, %arg4: memref<4x28xf32, #tpu.memory_space<vmem>>, %arg5: memref<4x1xf32, #tpu.memory_space<vmem>>, %arg6: memref<4x4xf32, #tpu.memory_space<vmem>>, %arg7: memref<4x1xf32, #tpu.memory_space<vmem>>, %arg8: memref<1x4x16xf32, #tpu.memory_space<vmem>>, %arg9: memref<4x144xf32, #tpu.memory_space<vmem>>, %arg10: memref<28x16xf32, #tpu.memory_space<vmem>>) attributes {dimension_semantics = [#tpu.dimension_semantics<parallel>, #tpu.dimension_semantics<parallel>], iteration_bounds = array<i64: 2, 1>, scalar_prefetch = 0 : i64, scratch_operands = 2 : i64, tpu.core_type = #tpu.core_type<tc>, window_params = [{transform_indices = @transform_0, window_bounds = array<i64: 1, 1, 4, 128>}, {transform_indices = @transform_1, window_bounds = array<i64: 1, 4, 16>}, {pipeline_mode = #tpu.pipeline_mode<synchronous>, transform_indices = @transform_2, window_bounds = array<i64: 4, 28>}, {pipeline_mode = #tpu.pipeline_mode<synchronous>, transform_indices = @transform_3, window_bounds = array<i64: 4, 1>}, {pipeline_mode = #tpu.pipeline_mode<synchronous>, transform_indices = @transform_4, window_bounds = array<i64: 4, 4>}, {pipeline_mode = #tpu.pipeline_mode<synchronous>, transform_indices = @transform_5, window_bounds = array<i64: 4, 1>}, {transform_indices = @transform_6, window_bounds = array<i64: 1, 4, 16>}]} {
    %c0 = arith.constant 0 : index
    %c0_0 = arith.constant 0 : index
    %c0_1 = arith.constant 0 : index
    %c0_2 = arith.constant 0 : index
    %0 = vector.load %arg2[%c0, %c0_0, %c0_1, %c0_2] : memref<1x1x4x128xf32, #tpu.memory_space<vmem>>, vector<1x1x4x128xf32>
    %1 = vector.shape_cast %0 : vector<1x1x4x128xf32> to vector<4x128xf32>
    %c0_3 = arith.constant 0 : index
    %c0_4 = arith.constant 0 : index
    %2 = vector.load %arg9[%c0_3, %c0_4] : memref<4x144xf32, #tpu.memory_space<vmem>>, vector<4x128xf32>
    tpu.vector_store %arg9[%c0_3, %c0_4], %1 {strides = array<i32>} : memref<4x144xf32, #tpu.memory_space<vmem>>, vector<4x128xf32>,
    %c0_5 = arith.constant 0 : index
    %c0_6 = arith.constant 0 : index
    %c0_7 = arith.constant 0 : index
    %3 = vector.load %arg3[%c0_5, %c0_6, %c0_7] : memref<1x4x16xf32, #tpu.memory_space<vmem>>, vector<1x4x16xf32>
    %4 = vector.shape_cast %3 : vector<1x4x16xf32> to vector<4x16xf32>
    %c0_8 = arith.constant 0 : index
    %c128 = arith.constant 128 : index
    %5 = vector.load %arg9[%c0_8, %c128] : memref<4x144xf32, #tpu.memory_space<vmem>>, vector<4x16xf32>
    tpu.vector_store %arg9[%c0_8, %c128], %4 {strides = array<i32>} : memref<4x144xf32, #tpu.memory_space<vmem>>, vector<4x16xf32>,
    %c0_9 = arith.constant 0 : index
    %c110 = arith.constant 110 : index
    %6 = vector.load %arg9[%c0_9, %c110] : memref<4x144xf32, #tpu.memory_space<vmem>>, vector<4x16xf32>
    %c0_10 = arith.constant 0 : index
    %c0_11 = arith.constant 0 : index
    %7 = vector.load %arg10[%c0_10, %c0_11] : memref<28x16xf32, #tpu.memory_space<vmem>>, vector<4x16xf32>
    tpu.vector_store %arg10[%c0_10, %c0_11], %6 {strides = array<i32>} : memref<28x16xf32, #tpu.memory_space<vmem>>, vector<4x16xf32>,
    %c0_12 = arith.constant 0 : index
    %c113 = arith.constant 113 : index
    %8 = vector.load %arg9[%c0_12, %c113] : memref<4x144xf32, #tpu.memory_space<vmem>>, vector<4x16xf32>
    %c4 = arith.constant 4 : index
    %c0_13 = arith.constant 0 : index
    %9 = vector.load %arg10[%c4, %c0_13] : memref<28x16xf32, #tpu.memory_space<vmem>>, vector<4x16xf32>
    tpu.vector_store %arg10[%c4, %c0_13], %8 {strides = array<i32>} : memref<28x16xf32, #tpu.memory_space<vmem>>, vector<4x16xf32>,
    %c0_14 = arith.constant 0 : index
    %c116 = arith.constant 116 : index
    %10 = vector.load %arg9[%c0_14, %c116] : memref<4x144xf32, #tpu.memory_space<vmem>>, vector<4x16xf32>
    %c8 = arith.constant 8 : index
    %c0_15 = arith.constant 0 : index
    %11 = vector.load %arg10[%c8, %c0_15] : memref<28x16xf32, #tpu.memory_space<vmem>>, vector<4x16xf32>
    tpu.vector_store %arg10[%c8, %c0_15], %10 {strides = array<i32>} : memref<28x16xf32, #tpu.memory_space<vmem>>, vector<4x16xf32>,
    %c0_16 = arith.constant 0 : index
    %c119 = arith.constant 119 : index
    %12 = vector.load %arg9[%c0_16, %c119] : memref<4x144xf32, #tpu.memory_space<vmem>>, vector<4x16xf32>
    %c12 = arith.constant 12 : index
    %c0_17 = arith.constant 0 : index
    %13 = vector.load %arg10[%c12, %c0_17] : memref<28x16xf32, #tpu.memory_space<vmem>>, vector<4x16xf32>
    tpu.vector_store %arg10[%c12, %c0_17], %12 {strides = array<i32>} : memref<28x16xf32, #tpu.memory_space<vmem>>, vector<4x16xf32>,
    %c0_18 = arith.constant 0 : index
    %c122 = arith.constant 122 : index
    %14 = vector.load %arg9[%c0_18, %c122] : memref<4x144xf32, #tpu.memory_space<vmem>>, vector<4x16xf32>
    %c16 = arith.constant 16 : index
    %c0_19 = arith.constant 0 : index
    %15 = vector.load %arg10[%c16, %c0_19] : memref<28x16xf32, #tpu.memory_space<vmem>>, vector<4x16xf32>
    tpu.vector_store %arg10[%c16, %c0_19], %14 {strides = array<i32>} : memref<28x16xf32, #tpu.memory_space<vmem>>, vector<4x16xf32>,
    %c0_20 = arith.constant 0 : index
    %c125 = arith.constant 125 : index
    %16 = vector.load %arg9[%c0_20, %c125] : memref<4x144xf32, #tpu.memory_space<vmem>>, vector<4x16xf32>
    %c20 = arith.constant 20 : index
    %c0_21 = arith.constant 0 : index
    %17 = vector.load %arg10[%c20, %c0_21] : memref<28x16xf32, #tpu.memory_space<vmem>>, vector<4x16xf32>
    tpu.vector_store %arg10[%c20, %c0_21], %16 {strides = array<i32>} : memref<28x16xf32, #tpu.memory_space<vmem>>, vector<4x16xf32>,
    %c0_22 = arith.constant 0 : index
    %c128_23 = arith.constant 128 : index
    %18 = vector.load %arg9[%c0_22, %c128_23] : memref<4x144xf32, #tpu.memory_space<vmem>>, vector<4x16xf32>
    %c24 = arith.constant 24 : index
    %c0_24 = arith.constant 0 : index
    %19 = vector.load %arg10[%c24, %c0_24] : memref<28x16xf32, #tpu.memory_space<vmem>>, vector<4x16xf32>
    tpu.vector_store %arg10[%c24, %c0_24], %18 {strides = array<i32>} : memref<28x16xf32, #tpu.memory_space<vmem>>, vector<4x16xf32>,
    %c0_25 = arith.constant 0 : index
    %c0_26 = arith.constant 0 : index
    %20 = vector.load %arg4[%c0_25, %c0_26] : memref<4x28xf32, #tpu.memory_space<vmem>>, vector<4x28xf32>
    %c0_27 = arith.constant 0 : index
    %c0_28 = arith.constant 0 : index
    %21 = vector.load %arg10[%c0_27, %c0_28] : memref<28x16xf32, #tpu.memory_space<vmem>>, vector<28x16xf32>
    %cst = arith.constant dense<0.000000e+00> : vector<4x16xf32>
    %22 = tpu.matmul %20, %21, %cst {dimension_numbers = #tpu.dot_dimension_numbers<[1], [0], [0], [1], [0, 0, 1, 1], [], []>} : vector<4x28xf32>, vector<28x16xf32>, vector<4x16xf32> -> vector<4x16xf32>
    %c0_29 = arith.constant 0 : index
    %c0_30 = arith.constant 0 : index
    %23 = vector.load %arg5[%c0_29, %c0_30] : memref<4x1xf32, #tpu.memory_space<vmem>>, vector<4x1xf32>
    %24 = vector.broadcast %23 : vector<4x1xf32> to vector<4x16xf32>
    %25 = arith.addf %22, %24 : vector<4x16xf32>
    %cst_31 = arith.constant 0.000000e+00 : f32
    %26 = vector.broadcast %cst_31 : f32 to vector<4x16xf32>
    %27 = arith.cmpf ogt, %25, %26 : vector<4x16xf32>
    %cst_32 = arith.constant 0.000000e+00 : f32
    %28 = vector.broadcast %cst_32 : f32 to vector<4x16xf32>
    %29 = arith.minimumf %25, %28 : vector<4x16xf32>
    %30 = math.exp %29 : vector<4x16xf32>
    %cst_33 = arith.constant 1.000000e+00 : f32
    %31 = vector.broadcast %cst_33 : f32 to vector<4x16xf32>
    %32 = arith.subf %30, %31 : vector<4x16xf32>
    %33 = arith.select %27, %25, %32 : vector<4x16xi1>, vector<4x16xf32>
    %c0_34 = arith.constant 0 : index
    %c0_35 = arith.constant 0 : index
    %34 = vector.load %arg6[%c0_34, %c0_35] : memref<4x4xf32, #tpu.memory_space<vmem>>, vector<4x4xf32>
    %cst_36 = arith.constant dense<0.000000e+00> : vector<4x16xf32>
    %35 = tpu.matmul %34, %33, %cst_36 {dimension_numbers = #tpu.dot_dimension_numbers<[1], [0], [0], [1], [0, 0, 1, 1], [], []>} : vector<4x4xf32>, vector<4x16xf32>, vector<4x16xf32> -> vector<4x16xf32>
    %c0_37 = arith.constant 0 : index
    %c0_38 = arith.constant 0 : index
    %36 = vector.load %arg7[%c0_37, %c0_38] : memref<4x1xf32, #tpu.memory_space<vmem>>, vector<4x1xf32>
    %37 = vector.broadcast %36 : vector<4x1xf32> to vector<4x16xf32>
    %38 = arith.addf %35, %37 : vector<4x16xf32>
    %c0_39 = arith.constant 0 : index
    %c0_40 = arith.constant 0 : index
    %c0_41 = arith.constant 0 : index
    %39 = vector.load %arg3[%c0_39, %c0_40, %c0_41] : memref<1x4x16xf32, #tpu.memory_space<vmem>>, vector<1x4x16xf32>
    %40 = vector.shape_cast %39 : vector<1x4x16xf32> to vector<4x16xf32>
    %41 = arith.addf %40, %38 : vector<4x16xf32>
    %c0_42 = arith.constant 0 : index
    %c0_43 = arith.constant 0 : index
    %c0_44 = arith.constant 0 : index
    %42 = vector.load %arg8[%c0_42, %c0_43, %c0_44] : memref<1x4x16xf32, #tpu.memory_space<vmem>>, vector<1x4x16xf32>
    %43 = vector.shape_cast %42 : vector<1x4x16xf32> to vector<4x16xf32>
    %44 = vector.shape_cast %41 : vector<4x16xf32> to vector<1x4x16xf32>
    tpu.vector_store %arg8[%c0_42, %c0_43, %c0_44], %44 {strides = array<i32>} : memref<1x4x16xf32, #tpu.memory_space<vmem>>, vector<1x4x16xf32>,
    return
  }
  func.func @transform_0(%arg0: i32, %arg1: i32) -> (i32, i32, i32, i32) {
    %c0_i32 = arith.constant 0 : i32
    %c0_i32_0 = arith.constant 0 : i32
    %c0_i32_1 = arith.constant 0 : i32
    return %arg0, %arg1, %c0_i32, %c0_i32_0 : i32, i32, i32, i32
  }
  func.func @transform_1(%arg0: i32, %arg1: i32) -> (i32, i32, i32) {
    %c0_i32 = arith.constant 0 : i32
    %c0_i32_0 = arith.constant 0 : i32
    return %arg0, %c0_i32, %arg1 : i32, i32, i32
  }
  func.func @transform_2(%arg0: i32, %arg1: i32) -> (i32, i32) {
    %c0_i32 = arith.constant 0 : i32
    %c0_i32_0 = arith.constant 0 : i32
    %c0_i32_1 = arith.constant 0 : i32
    return %c0_i32, %c0_i32_0 : i32, i32
  }
  func.func @transform_3(%arg0: i32, %arg1: i32) -> (i32, i32) {
    %c0_i32 = arith.constant 0 : i32
    %c0_i32_0 = arith.constant 0 : i32
    %c0_i32_1 = arith.constant 0 : i32
    return %c0_i32, %c0_i32_0 : i32, i32
  }
  func.func @transform_4(%arg0: i32, %arg1: i32) -> (i32, i32) {
    %c0_i32 = arith.constant 0 : i32
    %c0_i32_0 = arith.constant 0 : i32
    %c0_i32_1 = arith.constant 0 : i32
    return %c0_i32, %c0_i32_0 : i32, i32
  }
  func.func @transform_5(%arg0: i32, %arg1: i32) -> (i32, i32) {
    %c0_i32 = arith.constant 0 : i32
    %c0_i32_0 = arith.constant 0 : i32
    %c0_i32_1 = arith.constant 0 : i32
    return %c0_i32, %c0_i32_0 : i32, i32
  }
  func.func @transform_6(%arg0: i32, %arg1: i32) -> (i32, i32, i32) {
    %c0_i32 = arith.constant 0 : i32
    %c0_i32_0 = arith.constant 0 : i32
    return %arg0, %c0_i32, %arg1 : i32, i32, i32
  }
}

</mosaic_0001>

<bundles_post_ra>
// kernel: tpu_custom_call.1
= control target key start
LH: loop header
LB: loop body
LE: loop exit
PB: predicated region body
PF: predicated region fallthrough
CT: control target
= control target key end

     0   :  { %11 = vsyncpa [#allocation5], 0  ;;  %s1169_s0 = inlined_call_operand.vmem [shape: f32[2,1,4,128], index: 0, kind: input, shape index: {}]   ;;  %s1170_s1 = inlined_call_operand.hbm [shape: f32[2,4,16], index: 1, kind: input, shape index: {}]   ;;  %s1171_s2 = inlined_call_operand.vmem [shape: f32[4,28], index: 2, kind: input, shape index: {}]   ;;  %s1172_s3 = inlined_call_operand.vmem [shape: f32[4,1], index: 3, kind: input, shape index: {}]   ;;  %s1173_s4 = inlined_call_operand.vmem [shape: f32[4,4], index: 4, kind: input, shape index: {}]   ;;  %s1174_s5 = inlined_call_operand.vmem [shape: f32[4,1], index: 5, kind: input, shape index: {}]   ;;  %s1175_s6 = inlined_call_operand.hbm [shape: f32[2,4,16], index: 6, kind: output, shape index: {}]  }
   0x1   :  { %13 = vsyncpa [#allocation5 + $0x1], 0 }
   0x2   :  { %14 = vsyncpa [#allocation6], 0 }
   0x3   :  { %16 = vsyncpa [#allocation6 + $0x1], 0  ;;  %s961_s21 = smov 0   ;;  %s963_s22 = smov 0  }
   0x4   :  { %s965_s23 = smov 0   ;;  %s967_s24 = smov 0  }
   0x5   :  { %s969_s25 = smov 0   ;;  %s971_s26 = smov 0  }
   0x6 LB: > { %s672_s27 = sadd.s32 4294967295, %s911_s26   ;;  %s673_s28 = sadd.s32 4294967294, %s911_s26   ;;  %s911_s26 = sphi %s971_s26, %s22_s26   ;;  %s907_s25 = sphi %s969_s25, %s1191_s25   ;;  %s903_s24 = sphi %s967_s24, %s1190_s24   ;;  %s899_s23 = sphi %s965_s23, %s1189_s23   ;;  %s895_s22 = sphi %s963_s22, %s1188_s22   ;;  %s891_s21 = sphi %s961_s21, %s1187_s21  }
   0x7   : > { %s34_s29 = sadd.s32 1, %s907_s25  ;;  %s71_s30 = sadd.s32 1, %s899_s23 }
   0x8   : > { %p36_p0 = scmp.ge.s32.totalorder %s34_s29, 2  ;;  %p78_p1 = scmp.ne.s32.totalorder %s899_s23, %s895_s22 }
   0x9   : > { %p79_p2 = scmp.eq.s32.totalorder %s911_s26, 0  ;;  %p84_p3 = scmp.ne.s32.totalorder %s895_s22, %s891_s21 }
   0xa   : > { %s1193_s29 = smov (%p36_p0, %s34_s29), 0  ;;  %p85_p5 = scmp.eq.s32.totalorder %s672_s27, 0 }
   0xb   : > { %p1002_p4 = por %p79_p2, %p78_p1  ;;  %s66_s8 = ssub.s32 %s907_s25, %s1193_s29 }
   0xc   : > { %p194_p6 = scmp.eq.s32.totalorder %s672_s27, 1  ;;  %p69_p7 = scmp.eq.s32.totalorder %s66_s8, 0 }
   0xd   : > { %p1008_p8 = por %p85_p5, %p84_p3  ;;  %p200_p10 = scmp.eq.s32.totalorder %s673_s28, 1 }
   0xe   : > { %p1012_p9 = por %p194_p6, %p78_p1  ;;  %p733_p13 = scmp.lt.s32.totalorder %s911_s26, 2 }
   0xf   : > { %s1017_s11 = scalar_select %p69_p7, %s899_s23, %s71_s30  }
  0x10   : > { %s1179_s10 = scalar_select %p1012_p9, 1, 0 }
  0x11   : > { %p1019_p11 = por %p200_p10, %p84_p3  ;;  %s242_s13 = sand.u32 1, %s899_s23  }
  0x12   : > { %s676_s14 = sshll.u32 %s242_s13, 2  ;;  %s677_s15 = sshll.u32 %s907_s25, 6 }
  0x13   : > { %s1180_s12 = scalar_select %p1019_p11, 1, 0 }
  0x14   : > { %s1030_s18 = scalar_lea.hbm %s1170_s1, %s677_s15  ;;  %s246_s19 = scalar_lea.vmem [#allocation4], %s676_s14 }
  0x15   : > { %s254_s20 = sshll.u32 %s246_s19, 4  ;;  %p1036_p0 = pnand %p733_p13, %p1002_p4  ;;  %s1032_s20 = int_to_ptr.vmem [resolvable:$true] %s254_s20 }
  0x16   : > { %s243_s28 = scalar_lea.sflag [#allocation5], %s242_s13  ;;  %s799_s30 = scalar_lea.hbm %s1030_s18, 64 }
  0x17   : > { %p800_p3 = scmp.ne.s32.totalorder %s1030_s18, %s799_s30  ;;  %p801_p5 = pneg %p1036_p0 }
  0x18   : > { %s804_s7 = scalar_lea.hbm %s1170_s1, 128  ;;  %p805_p4 = scmp.lt.u32.totalorder %s1030_s18, %s1170_s1 }
  0x19   : > { %p802_p6 = pnand %p801_p5, %p800_p3  ;;  %p806_p10 = scmp.lt.u32.totalorder %s804_s7, %s799_s30 }
  0x1a   : > { %p808_p12 = scmp.lt.u32.totalorder %s799_s30, %s1030_s18 }
  0x1b   : > { %p803_p7 = pneg %p802_p6  ;;  %p807_p13 = por %p806_p10, %p805_p4 }
  0x1d   : > { %p809_p1 = por %p808_p12, %p807_p13 }
  0x1f   : > { %p810_p2 = pnand %p809_p1, %p803_p7 }
  0x21   : > { %813 = shalt.err (!%p810_p2)
}
  0x22   : > { %s814_s13 = scalar_lea.vmem %s1032_s20, 64  ;;  %s913_s17 = smov [#allocation4]  }
  0x23   : > { %p815_p3 = scmp.ne.s32.totalorder %s1032_s20, %s814_s13  ;;  %s819_s19 = sshll.u32 %s913_s17, 4  ;;  %s820_s19 = int_to_ptr.vmem [resolvable:$false] %s819_s19 }
  0x24   : > { %s821_s8 = scalar_lea.vmem %s820_s19, 128  ;;  %p822_p9 = scmp.lt.s32.totalorder %s1032_s20, %s820_s19 }
  0x25   : > { %p817_p6 = pnand %p815_p3, %p801_p5  ;;  %p823_p4 = scmp.lt.s32.totalorder %s821_s8, %s814_s13 }
  0x27   : > { %p818_p11 = pneg %p817_p6  ;;  %p824_p10 = por %p823_p4, %p822_p9 }
  0x29   : > { %p825_p12 = pnand %p824_p10, %p818_p11 }
  0x2b   : > { %828 = shalt.err (!%p825_p12)
}
  0x2c   : > { %728 = dma.hbm_to_vmem [thread:$0]  (!%p1036_p0), %s1030_s18, 64, %s1032_s20, %s243_s28  }
  0x2d   : > { %p1182_p1 = scmp.lt.s32.totalorder %s911_s26, 3  ;;  %p1183_p2 = scmp.ge.s32.totalorder %s911_s26, 1 }
  0x2f   : > { %p260_p5 = pnand %p1183_p2, %p1182_p1 }
  0x30   : > { %s1072_s30 = sand.u32 (!%p260_p5), 1, %s895_s22  }
  0x31   : > { %263 = sbr.rel (%p260_p5) target bundleno = 684 (0x2ac), region = 44  ;;  %s679_s14 = sshll.u32 (!%p260_p5), %s1072_s30, 2 }
  0x32   : > { %s266_s7 = scalar_lea.sflag (!%p260_p5), [#allocation5], %s1072_s30  ;;  %s1078_s27 = scalar_lea.vmem (!%p260_p5), [#allocation4], %s679_s14 }
  0x38   : > { %882 = dma.done.wait (%p1008_p8), %s266_s7, 64  }
  0x39   : > { %884 = vsyncadd (%p1008_p8), %s266_s7, 4294967232  ;;  %p305_p9 = scmp.lt.s32.totalorder %s903_s24, 1  ;;  %vm315_vm0 = vcmask 125952   ;;  %v314_v1 = vld [vmem:[%s1078_s27] sm:$0xf]  ;;  %s914_s13 = smov 12  }
  0x3a   : > { %316 = vst.msk [vmem:[#allocation2 + $0x4] sm:$0xf] %vm315_vm0, %v314_v1  ;;  %s915_s9 = smov 15   ;;  %s916_s17 = smov 6   ;;  %v919_v6 = vmov 0.0|0.0   ;;  %vm921_vm1 = vmmov 0  }
  0x3b   : > { %s306_s18 = scalar_select %p305_p9, %s903_s24, 1  ;;  %714 = vmatprep.subr.bf16.mxu0 %v919_v6  ;;  %v922_v7 = vmov 0.0   ;;  %v385_v8 = vld [vmem:[%s1172_s3] sm:$0xf]  ;;  %v923_v9 = vmov 0   ;;  %vm341_vm2 = vcmask 97280  }
  0x3c   : > { %s917_s19 = smov 9   ;;  %s918_s8 = smov 18   ;;  %706 = vmatprep.mubr.msk.f32.mxu0 %vm921_vm1, %v922_v7  ;;  %709 = vmatprep.subr.mxu1 %v922_v7  ;;  %vm352_vm3 = vcmask 72704   ;;  %vm330_vm4 = vcmask 121856   ;;  %vm363_vm5 = vcmask 48128   ;;  %vm374_vm6 = vcmask 23552  }
  0x3d   : > { %s681_s20 = sshll.u32 %s306_s18, 2  ;;  %s920_s7 = smov 3   ;;  %711 = vmatprep.mubr.msk.f32.mxu1 %vm921_vm1, %v922_v7  ;;  %794 = vset.pattern.permute.xlu1 %v923_v9  ;;  %vm395_vm7 = vcmask 1043456   ;;  %vm924_vm8 = vmmov 1   ;;  %v380_v32 = vld [vmem:[%s1171_s2] sm:$0xf] }
  0x3e   : > { %s311_s16 = scalar_lea.vmem %s1169_s0, %s681_s20  ;;  %795 = vset.pattern.permute.xlu0 %v923_v9  ;;  %vm719_vm9 = vmpackc.low %vm395_vm7, %vm924_vm8  ;;  %vm391_vm10 = vcmask 228352   ;;  %v476_v33 = vld [vmem:[%s1174_s5] sm:$0xf]  ;;  %vm482_vm12 = vcmask 31744   ;;  %v559_v46 = vld [vmem:[%s1078_s27] sm:$0xf] }
  0x3f   : > { %v312_v0 = vld [vmem:[%s311_s16] sm:$0xf]  ;;  %s563_s27 = scalar_lea.sflag [#allocation6], %s1072_s30  ;;  %p1184_p11 = scmp.ne.s32.totalorder %s1179_s10, 0 }
  0x40   : > { %313 = vst [vmem:[#allocation2] sm:$0xf] %v312_v0  ;;  %v475_v42 = vld [vmem:[%s1173_s4] sm:$0xf] }
  0x41   : > { %v378_v5 = vld [vmem:[#allocation2 + $0x4] sm:$0xf] }
  0x42   : > { %379 = vst.msk [vmem:[#allocation3 + $0x18] sm:$0xf] %vm315_vm0, %v378_v5 }
  0x47   : > { %v334_v2 = vld [vmem:[#allocation2] sm:$0xff] }
  0x48   : > { %337 = vrot.lane.b32.xlu1 %v334_v2, %s914_s13  ;;  %326 = vrot.lane.b32.xlu0 %v334_v2, %s915_s9  ;;  %v336_v3 = vcombine.high %v334_v2, %v334_v2  ;;  %v317_v4 = vld [vmem:[#allocation2] sm:$0xf] }
  0x49   : > { %v384_v29 = vld [vmem:[#allocation3 + $0x18] sm:$0xf] }
  0x4c   : > { %359 = vrot.lane.b32.xlu1 %v334_v2, %s916_s17  ;;  %348 = vrot.lane.b32.xlu0 %v334_v2, %s917_s19 }
  0x50   : > { %339 = vrot.lane.b32.xlu1 %v336_v3, %s914_s13  ;;  %319 = vrot.lane.b32.xlu0 %v317_v4, %s918_s8  ;;  %s304_s8 = scalar_lea.vmem [#allocation7], %s679_s14  ;;  %s925_s14 = smov [#allocation7]  }
  0x51   : > { %s833_s15 = sshll.u32 %s925_s14, 4  ;;  %s834_s15 = int_to_ptr.vmem [resolvable:$false] %s833_s15 }
  0x52   : > { %s835_s16 = scalar_lea.vmem %s834_s15, 128 }
  0x54   : > { %350 = vrot.lane.b32.xlu1 %v336_v3, %s917_s19  ;;  %328 = vrot.lane.b32.xlu0 %v336_v3, %s915_s9  ;;  %s688_s19 = sshll.u32 %s903_s24, 6 }
  0x55   : > { %s1119_s28 = scalar_lea.hbm %s1175_s6, %s688_s19 }
  0x58   : > { %361 = vrot.lane.b32.xlu0 %v336_v3, %s916_s17  ;;  %370 = vrot.lane.b32.xlu1 %v334_v2, %s920_s7 }
  0x5c   : > { %372 = vrot.lane.b32.xlu0 %v336_v3, %s920_s7  ;;  %388 = vperm.xlu1 %794, %v385_v8   ;;  %s577_s7 = sshll.u32 %s304_s8, 4  ;;  %s1121_s7 = int_to_ptr.vmem [resolvable:$true] %s577_s7 }
  0x5d   : > { %s829_s24 = scalar_lea.vmem %s1121_s7, 64  ;;  %p836_p13 = scmp.lt.s32.totalorder %s1121_s7, %s834_s15 }
  0x5e   : > { %p830_p8 = scmp.ne.s32.totalorder %s1121_s7, %s829_s24  ;;  %p837_p3 = scmp.lt.s32.totalorder %s835_s16, %s829_s24 }
  0x60   : > { %479 = vperm.xlu0 %795, %v476_v33   ;;  %p831_p0 = pnand %p830_p8, %p1184_p11  ;;  %p838_p6 = por %p837_p3, %p836_p13 }
  0x62   : > { %p832_p7 = pneg %p831_p0 }
  0x64   : > { %p839_p4 = pnand %p838_p6, %p832_p7 }
  0xba   : > { %v338_v10 = vpop.permute.xlu1 %337  ;;  %v327_v11 = vpop.permute.xlu0 %326 }
  0xbe   : > { %v360_v12 = vpop.permute.xlu1 %359  ;;  %v349_v13 = vpop.permute.xlu0 %348 }
  0xc2   : > { %v340_v14 = vpop.permute.xlu1 %339  ;;  %v320_v15 = vpop.permute.xlu0 %319 }
  0xc3   : > { %v342_v16 = vsel %vm341_vm2, %v338_v10, %v340_v14  ;;  %322 = vst.msk [vmem:[#allocation3] sm:$0xf] %vm315_vm0, %v320_v15 }
  0xc4   : > { %344 = vst.msk [vmem:[#allocation3 + $0x8] sm:$0xf] %vm315_vm0, %v342_v16 }
  0xc6   : > { %v351_v17 = vpop.permute.xlu1 %350  ;;  %v329_v18 = vpop.permute.xlu0 %328 }
  0xc7   : > { %v353_v19 = vsel %vm352_vm3, %v349_v13, %v351_v17  ;;  %v331_v20 = vsel %vm330_vm4, %v327_v11, %v329_v18 }
  0xc8   : > { %355 = vst.msk [vmem:[#allocation3 + $0xc] sm:$0xf] %vm315_vm0, %v353_v19  ;;  %333 = vst.msk [vmem:[#allocation3 + $0x4] sm:$0xf] %vm315_vm0, %v331_v20 }
  0xca   : > { %v362_v21 = vpop.permute.xlu0 %361  ;;  %v371_v23 = vpop.permute.xlu1 %370 }
  0xcb   : > { %v364_v22 = vsel %vm363_vm5, %v360_v12, %v362_v21 }
  0xcc   : > { %366 = vst.msk [vmem:[#allocation3 + $0x10] sm:$0xf] %vm315_vm0, %v364_v22 }
  0xce   : > { %v373_v24 = vpop.permute.xlu0 %372 }
  0xcf   : > { %v375_v25 = vsel %vm374_vm6, %v371_v23, %v373_v24  ;;  %v381_v26 = vld [vmem:[#allocation3] sm:$0xff]  ;;  %v382_v27 = vld [vmem:[#allocation3 + $0x8] sm:$0xff] }
  0xd0   : > { %377 = vst.msk [vmem:[#allocation3 + $0x14] sm:$0xf] %vm315_vm0, %v375_v25  ;;  %v715_v28 = vpack.c.bf16 %v382_v27, %v381_v26 }
  0xd2   : > { %716 = vmatpush3.bf16.msra.mxu0 %v715_v28 }
  0xd3   : > { %717 = vmatprep.subr.bf16.mxu0 %v919_v6 }
  0xd7   : > { %v383_v30 = vld [vmem:[#allocation3 + $0x10] sm:$0xff] }
  0xd8   : > { %v718_v31 = vpack.c.bf16 %v384_v29, %v383_v30 }
  0xda   : > { %720 = vmatpush3.bf16.msk.msra.mxu0 %vm719_vm9, %v718_v31 }
  0xdb   : > { %v389_v34 = vpop.permute.xlu1 %388 }
  0xdd   : > { %707 = vmatmul.mubr.msk.f32.vlgmr.msra.gmra.mrb[0].mxu0 %vm391_vm10, %v380_v32 }
  0xdf   : > { %v480_v44 = vpop.permute.xlu0 %479 }
 0x1b0   : > { %v465_v35 = vpop.f32.mrb[0].mxu0 }
 0x1b1   : > { %v466_v36 = vadd.f32 %v465_v35, %v389_v34  ;;  %v708_v37 = vpop.f32.mrb[1].mxu0 }
 0x1b3   : > { %v470_v38 = vmin.f32 %v466_v36, 0.0  ;;  %vm469_vm11 = vcmp.gt.f32.partialorder %v466_v36, 0.0 }
 0x1b5   : > { %v471_v39 = vmul.f32 1.442695, %v470_v38 }
 0x1b7   : > { %797 = vpow2.f32 %v471_v39 }
 0x1c1   : > { %v798_v40 = vpop.eup %797 }
 0x1c2   : > { %v684_v41 = vadd.f32 -1.0, %v798_v40 }
 0x1c4   : > { %v474_v43 = vsel %vm469_vm11, %v466_v36, %v684_v41 }
 0x1c5   : > { %710 = vmatpush3.msk.msra.mxu1 %vm395_vm7, %v474_v43 }
 0x1c6   : > { %712 = vmatmul.mubr.msk.f32.vlgmr.msra.gmra.mrb[0].mxu1 %vm482_vm12, %v475_v42 }
 0x299   : > { %v555_v45 = vpop.f32.mrb[0].mxu1 }
 0x29a   : > { %v556_v47 = vadd.f32 %v555_v45, %v480_v44  ;;  %v713_v48 = vpop.f32.mrb[1].mxu1 }
 0x29c   : > { %v560_v49 = vadd.f32 %v559_v46, %v556_v47 }
 0x29e   : > { %561 = vst.msk [vmem:[%s304_s8] sm:$0xf] %vm315_vm0, %v560_v49 }
 0x29f   : > { %842 = shalt.err (!%p839_p4)
}
 0x2a0   : > { %s843_s30 = scalar_lea.hbm %s1119_s28, 64  ;;  %s847_s17 = scalar_lea.hbm %s1175_s6, 128 }
 0x2a1   : > { %p844_p10 = scmp.ne.s32.totalorder %s1119_s28, %s843_s30  ;;  %p848_p2 = scmp.lt.u32.totalorder %s1119_s28, %s1175_s6 }
 0x2a2   : > { %p849_p5 = scmp.lt.u32.totalorder %s847_s17, %s843_s30  ;;  %p851_p8 = scmp.lt.u32.totalorder %s843_s30, %s1119_s28 }
 0x2a3   : > { %p845_p12 = pnand %p844_p10, %p1184_p11 }
 0x2a4   : > { %p850_p9 = por %p849_p5, %p848_p2 }
 0x2a5   : > { %p846_p1 = pneg %p845_p12 }
 0x2a6   : > { %p852_p0 = por %p851_p8, %p850_p9 }
 0x2a8   : > { %p853_p7 = pnand %p852_p0, %p846_p1 }
 0x2aa   : > { %856 = shalt.err (!%p853_p7)
}
 0x2ab   : > { %723 = dma.vmem_to_hbm [thread:$0]  (%p1184_p11), %s1121_s7, 64, %s1119_s28, %s563_s27  }
 0x2ac PF: > { %s589_s18 = sand.u32 1, %s891_s21   ;;  %p1185_p13 = scmp.ne.s32.totalorder %s1180_s12, 0 }
 0x2ad   : > { %p1186_p3 = scmp.ge.s32.totalorder %s911_s26, 2  ;;  %s590_s20 = scalar_lea.sflag [#allocation6], %s589_s18 }
 0x2af   : > { %p730_p6 = pnand %p1186_p3, %p1185_p13 }
 0x2b1   : > { %886 = dma.done.wait (!%p730_p6), %s590_s20, 64  }
 0x2b2   : > { %888 = vsyncadd (!%p730_p6), %s590_s20, 4294967232  ;;  %s22_s26 = sadd.s32 1, %s911_s26   ;;  %s1187_s21 = smov %s895_s22 }
 0x2b3   : > { %p19_p4 = scmp.ge.s32.totalorder %s22_s26, 4   ;;  %s1188_s22 = smov %s899_s23 }
 0x2b4   : > { %s1189_s23 = smov %s1017_s11  ;;  %s1190_s24 = smov %s907_s25 }
 0x2b5   : > { %s1191_s25 = smov %s1193_s29  ;;  %21 = sbr.rel (!%p19_p4) target bundleno = 6 (0x6), region = 92 }
 0x2bc   :  { %595 = vsyncpa [#allocation5], 1 }
 0x2bd   :  { %597 = vsyncpa [#allocation5 + $0x1], 1 }
 0x2be   :  { %598 = vsyncpa [#allocation6], 1 }
 0x2bf   :  { %600 = vsyncpa [#allocation6 + $0x1], 1 }

</bundles_post_ra>
